<compile_context>
chip_gen: v6e
topology: v6e:2x2x1
jax: 0.10.0
libtpu: 0.0.40
codegen_flags: <defaults>
</compile_context>

<pallas_src>
import functools

import jax
import jax.numpy as jnp
from jax.experimental import pallas as pl
from jax.experimental.pallas import tpu as pltpu

_LANES = 128
_TARGET_TILE_BYTES = 2 << 20  # ~2 MiB per buffer; ~8 MiB with 2x(in+out) buffering


def _sublane_pack(itemsize: int) -> int:
    # Sublane packing factor (rows per 32-bit sublane word) for the dtype.
    return {4: 8, 2: 16, 1: 32}.get(itemsize, 8)


def _choose_block_rows(rows: int, lanes: int, itemsize: int) -> int:
    """Largest sublane-aligned row tile within the per-buffer VMEM budget."""
    pack = _sublane_pack(itemsize)
    br = (_TARGET_TILE_BYTES // max(lanes * itemsize, 1)) // pack * pack
    br = max(br, pack)
    if br >= rows:
        return rows  # full row extent is always a legal block shape
    return int(br)


def _scale_kernel(x_ref, o_ref, *, fn, scale, compute_dtype):
    # Fused: out = fn(x) * scale on the VMEM-resident tile.
    x = x_ref[...].astype(compute_dtype)
    o_ref[...] = (fn(x) * jnp.asarray(scale, compute_dtype)).astype(o_ref.dtype)


def scale_forward(x, *, scale, fn, elementwise=True, block_rows=None,
                  vmem_limit_bytes=32 << 20, donate_input=False):
    """Pallas equivalent of Scale(scale, fn).forward(x).

    x: arbitrary-rank array.  fn: JAX-traceable function.
    elementwise=True  -> fn treated as purely elementwise; data may be viewed
                         as a lane-dense (rows, 128) slab (zero-copy reshape).
    elementwise=False -> fn is applied per-row over the last dim; the last dim
                         stays on lanes and is never split across tiles.
    """
    # TODO(synk): if `fn` is a full sub-module with weights (e.g. FeedForward),
    # the weights must be passed as explicit kernel operands with their own
    # BlockSpecs + MXU K-tiling; closure-fusion here covers elementwise /
    # per-row fns only.
    orig_shape = x.shape
    orig_dtype = x.dtype
    itemsize = jnp.dtype(orig_dtype).itemsize

    if x.ndim == 0:
        x = x.reshape(1, 1)

    # bf16/fp16 I/O, f32 compute (native VALU/EUP path on v5e; harmless elsewhere).
    if jnp.issubdtype(orig_dtype, jnp.floating) and itemsize < 4:
        compute_dtype = jnp.float32
    else:
        compute_dtype = orig_dtype

    if elementwise and (x.size % _LANES == 0):
        # Zero-copy view as a lane-dense slab: unmasked full-lane stores.
        x2 = x.reshape(-1, _LANES)
    else:
        # Zero-copy view as (rows, last_dim); last dim is the full block
        # extent (legal for any size).  No padding copies are introduced.
        x2 = x.reshape(-1, x.shape[-1])

    rows, lanes = x2.shape
    pack = _sublane_pack(itemsize)
    if block_rows is None:
        block_rows = _choose_block_rows(rows, lanes, itemsize)
    else:
        block_rows = min(int(block_rows), rows)
        if block_rows < rows and block_rows % pack != 0:
            raise ValueError(
                f"block_rows={block_rows} must be a multiple of {pack} for "
                f"dtype {orig_dtype} (or equal the full row count {rows})")

    grid = (pl.cdiv(rows, block_rows),)

    n_elem = rows * lanes
    cost = pl.CostEstimate(
        flops=2 * n_elem,                       # fn + scale, elementwise
        transcendentals=n_elem,                 # e.g. gelu/exp/tanh inside fn
        bytes_accessed=2 * n_elem * itemsize,   # one read + one write of the slab
    )

    extra_kwargs = {}
    if donate_input:
        extra_kwargs["input_output_aliases"] = {0: 0}

    out2 = pl.pallas_call(
        functools.partial(_scale_kernel, fn=fn, scale=scale,
                          compute_dtype=compute_dtype),
        out_shape=jax.ShapeDtypeStruct((rows, lanes), orig_dtype),
        grid_spec=pltpu.PrefetchScalarGridSpec(
            num_scalar_prefetch=0,
            grid=grid,
            in_specs=[pl.BlockSpec((block_rows, lanes), lambda i: (i, 0))],
            out_specs=pl.BlockSpec((block_rows, lanes), lambda i: (i, 0)),
        ),
        compiler_params=pltpu.CompilerParams(
            dimension_semantics=("parallel",),
            vmem_limit_bytes=vmem_limit_bytes,
        ),
        cost_estimate=cost,
        **extra_kwargs,
    )(x2)

    return out2.reshape(orig_shape)


class ScalePallas:
    """Mirror of the PyTorch Scale module."""

    def __init__(self, scale, fn, elementwise=True):
        self.scale = scale
        self.fn = fn
        self.elementwise = elementwise

    def __call__(self, x):
        return scale_forward(x, scale=self.scale, fn=self.fn,
                             elementwise=self.elementwise)


if __name__ == "__main__":
    key = jax.random.PRNGKey(0)
    fn = jax.nn.gelu
    scale = 0.5
    module = ScalePallas(scale, fn)

    # 1) Small conformer-like shape: batch=2, seq=8, hidden=32 -> size % 128 == 0,
    #    lane-dense flat path, single full block.
    B, T, D = 2, 8, 32
    x = jax.random.normal(key, (B, T, D), dtype=jnp.float32)
    out = jax.block_until_ready(module(x))
    ref = fn(x) * scale
    assert out.shape == (B, T, D)
    assert jnp.allclose(out, ref, atol=1e-6), "mismatch vs reference (case 1)"

    # 2) Shape whose flattened size is NOT a multiple of 128 (exercises the
    #    zero-copy (rows, last_dim) fallback path with masked lane tail).
    x2 = jax.random.normal(jax.random.PRNGKey(1), (2, 7, 33), dtype=jnp.float32)
    out2 = jax.block_until_ready(module(x2))
    ref2 = fn(x2) * scale
    assert jnp.allclose(out2, ref2, atol=1e-6), "mismatch vs reference (case 2)"

    # 3) Explicit small block_rows to exercise the multi-block pipelined grid.
    x3 = jax.random.normal(jax.random.PRNGKey(2), (2, 64, 192), dtype=jnp.float32)
    out3 = jax.block_until_ready(
        scale_forward(x3, scale=scale, fn=fn, block_rows=64))
    ref3 = fn(x3) * scale
    assert jnp.allclose(out3, ref3, atol=1e-6), "mismatch vs reference (case 3)"

    # 4) bf16 I/O, f32 in-kernel compute.
    x4 = jax.random.normal(jax.random.PRNGKey(3), (2, 8, 128), dtype=jnp.bfloat16)
    out4 = jax.block_until_ready(module(x4))
    ref4 = (fn(x4.astype(jnp.float32)) * scale).astype(jnp.bfloat16)
    assert jnp.allclose(out4.astype(jnp.float32), ref4.astype(jnp.float32),
                        atol=2e-2), "mismatch vs reference (case 4)"

    # 5) Per-row fn (softmax over last dim) via elementwise=False.
    x5 = jax.random.normal(jax.random.PRNGKey(4), (2, 8, 32), dtype=jnp.float32)
    out5 = jax.block_until_ready(
        scale_forward(x5, scale=scale,
                      fn=lambda t: jax.nn.softmax(t, axis=-1),
                      elementwise=False))
    ref5 = jax.nn.softmax(x5, axis=-1) * scale
    assert jnp.allclose(out5, ref5, atol=1e-6), "mismatch vs reference (case 5)"

    print("KERNEL_OK")
</pallas_src>

<mosaic_0001>
module attributes {stable_mosaic.version = 11 : i64} {
  func.func @_scale_kernel(%arg0: i32, %arg1: memref<4x128xf32, #tpu.memory_space<vmem>>, %arg2: memref<4x128xf32, #tpu.memory_space<vmem>>) attributes {dimension_semantics = [#tpu.dimension_semantics<parallel>], iteration_bounds = array<i64: 1>, scalar_prefetch = 0 : i64, scratch_operands = 0 : i64, tpu.core_type = #tpu.core_type<tc>, window_params = [{transform_indices = @transform_0, window_bounds = array<i64: 4, 128>}, {transform_indices = @transform_1, window_bounds = array<i64: 4, 128>}]} {
    %c0 = arith.constant 0 : index
    %c0_0 = arith.constant 0 : index
    %0 = vector.load %arg1[%c0, %c0_0] : memref<4x128xf32, #tpu.memory_space<vmem>>, vector<4x128xf32>
    %1 = arith.mulf %0, %0 : vector<4x128xf32>
    %2 = arith.mulf %0, %1 : vector<4x128xf32>
    %cst = arith.constant 4.471500e-02 : f32
    %3 = vector.broadcast %cst : f32 to vector<4x128xf32>
    %4 = arith.mulf %3, %2 : vector<4x128xf32>
    %5 = arith.addf %0, %4 : vector<4x128xf32>
    %cst_1 = arith.constant 0.797884583 : f32
    %6 = vector.broadcast %cst_1 : f32 to vector<4x128xf32>
    %7 = arith.mulf %6, %5 : vector<4x128xf32>
    %8 = math.tanh %7 : vector<4x128xf32>
    %cst_2 = arith.constant 1.000000e+00 : f32
    %9 = vector.broadcast %cst_2 : f32 to vector<4x128xf32>
    %10 = arith.addf %9, %8 : vector<4x128xf32>
    %cst_3 = arith.constant 5.000000e-01 : f32
    %11 = vector.broadcast %cst_3 : f32 to vector<4x128xf32>
    %12 = arith.mulf %11, %10 : vector<4x128xf32>
    %13 = arith.mulf %0, %12 : vector<4x128xf32>
    %cst_4 = arith.constant 5.000000e-01 : f32
    %14 = vector.broadcast %cst_4 : f32 to vector<4x128xf32>
    %15 = arith.mulf %13, %14 : vector<4x128xf32>
    %c0_5 = arith.constant 0 : index
    %c0_6 = arith.constant 0 : index
    %16 = vector.load %arg2[%c0_5, %c0_6] : memref<4x128xf32, #tpu.memory_space<vmem>>, vector<4x128xf32>
    tpu.vector_store %arg2[%c0_5, %c0_6], %15 {strides = array<i32>} : memref<4x128xf32, #tpu.memory_space<vmem>>, vector<4x128xf32>,
    return
  }
  func.func @transform_0(%arg0: i32) -> (i32, i32) {
    %c0_i32 = arith.constant 0 : i32
    %c0_i32_0 = arith.constant 0 : i32
    return %arg0, %c0_i32 : i32, i32
  }
  func.func @transform_1(%arg0: i32) -> (i32, i32) {
    %c0_i32 = arith.constant 0 : i32
    %c0_i32_0 = arith.constant 0 : i32
    return %arg0, %c0_i32 : i32, i32
  }
}

</mosaic_0001>

<bundles_post_ra>
// kernel: tpu_custom_call.1
= control target key start
LH: loop header
LB: loop body
LE: loop exit
PB: predicated region body
PF: predicated region fallthrough
CT: control target
= control target key end

     0   :  { %6 = vsyncpa [#allocation3], 0  ;;  %s114_s0 = inlined_call_operand.hbm [shape: f32[4,128], index: 0, kind: input, shape index: {}]   ;;  %s115_s1 = inlined_call_operand.hbm [shape: f32[4,128], index: 1, kind: output, shape index: {}]  }
   0x1   :  { %7 = vsyncpa [#allocation4], 0  ;;  %s96_s6 = smov [#allocation2]  }
   0x2   :  { %s14_s7 = sshll.u32 %s96_s6, 4  ;;  %s15_s7 = int_to_ptr.vmem [resolvable:$true] %s14_s7 }
   0x3   :  { %s60_s8 = scalar_lea.vmem %s15_s7, 64  ;;  %p65_p1 = scmp.lt.s32.totalorder %s15_s7, %s15_s7 }
   0x4   :  { %p61_p0 = scmp.ne.s32.totalorder %s15_s7, %s60_s8  ;;  %p66_p2 = scmp.lt.s32.totalorder %s60_s8, %s60_s8 }
   0x6   :  { %p67_p3 = por %p66_p2, %p65_p1 }
   0x8   :  { %p68_p4 = pnand %p67_p3, %p61_p0 }
   0xa   :  { %71 = shalt.err (!%p68_p4)
}
   0xb   :  { %17 = dma.hbm_to_vmem [thread:$0]  %s114_s0, 64, %s15_s7, [#allocation3]  }
   0xc   :  { %92 = dma.done.wait [#allocation3], 64  }
   0xd   :  { %93 = vsyncadd [#allocation3], 4294967232  ;;  %v21_v0 = vld [vmem:[#allocation2] sm:$0xf]  ;;  %s97_s11 = smov [#allocation5]  }
   0xe   :  { %v22_v1 = vmul.f32 %v21_v0, %v21_v0  ;;  %s39_s12 = sshll.u32 %s97_s11, 4  ;;  %s40_s12 = int_to_ptr.vmem [resolvable:$true] %s39_s12 }
   0xf   :  { %s72_s13 = scalar_lea.vmem %s40_s12, 64  ;;  %p77_p6 = scmp.lt.s32.totalorder %s40_s12, %s40_s12 }
  0x10   :  { %v23_v2 = vmul.f32 %v22_v1, %v21_v0  ;;  %p73_p5 = scmp.ne.s32.totalorder %s40_s12, %s72_s13  ;;  %p78_p7 = scmp.lt.s32.totalorder %s72_s13, %s72_s13 }
  0x12   :  { %v24_v3 = vmul.f32 0.044715, %v23_v2  ;;  %p79_p8 = por %p78_p7, %p77_p6 }
  0x14   :  { %v25_v4 = vadd.f32 %v24_v3, %v21_v0  ;;  %p80_p9 = pnand %p79_p8, %p73_p5 }
  0x16   :  { %v26_v5 = vmul.f32 0.7978846, %v25_v4 }
  0x18   :  { %50 = vtanh.f32 %v26_v5 }
  0x25   :  { %v51_v6 = vpop.eup %50 }
  0x26   :  { %v28_v7 = vadd.f32 1.0, %v51_v6 }
  0x28   :  { %v29_v8 = vmul.f32 0.5, %v28_v7 }
  0x2a   :  { %v30_v9 = vmul.f32 %v29_v8, %v21_v0 }
  0x2c   :  { %v31_v10 = vmul.f32 0.5, %v30_v9 }
  0x2e   :  { %32 = vst [vmem:[#allocation5] sm:$0xf] %v31_v10 }
  0x2f   :  { %83 = shalt.err (!%p80_p9)
}
  0x30   :  { %42 = dma.vmem_to_hbm [thread:$0]  %s40_s12, 64, %s115_s1, [#allocation4]  }
  0x31   :  { %94 = dma.done.wait [#allocation4], 64  }
  0x32   :  { %95 = vsyncadd [#allocation4], 4294967232 }
  0x33   :  { %46 = vsyncpa [#allocation3], 1 }
  0x34   :  { %47 = vsyncpa [#allocation4], 1 }

</bundles_post_ra>
